<compile_context>
chip_gen: v6e
topology: v6e:2x2x1
jax: 0.10.0
libtpu: 0.0.40
codegen_flags: <defaults>
</compile_context>

<pallas_src>
import jax
import jax.numpy as jnp
from jax.experimental import pallas as pl
from jax.experimental.pallas import tpu as pltpu

_EPS = 1e-5


def _largest_divisor_leq(n, cap):
    for d in range(min(n, cap), 0, -1):
        if n % d == 0:
            return d
    return 1


def _l_tile_cap():
    # Generation-aware default: roughly half-size tiles on 64 MiB-VMEM parts (v7x)
    # vs the 128 MiB parts (v5e/v6e).  Guarded so it also works off-TPU / at trace time.
    try:
        vmem = pltpu.get_tpu_info().vmem_capacity_bytes
    except Exception:
        vmem = 128 << 20
    return 512 if vmem <= (64 << 20) else 1024


def _auto_l_tile(L):
    if L % 128 != 0:
        return L                         # block dim == full array dim is always legal
    cap = _l_tile_cap()
    if L <= cap:
        return L
    for t in range(cap, 127, -128):      # largest multiple-of-128 divisor of L <= cap
        if L % t == 0:
            return t
    return 128


# ----------------------------------------------------------------------------- kernel
def _make_fused_kernel(K, dilation, pad, has_ds, B_blk):
    """Fused downsample(1x1) + conv1+BN1+ReLU + conv2+BN2 + residual + ReLU.

    Layout is NCL: channels on the sublane axis, length on the 128-lane axis.  Each
    dilated conv is K accumulated MXU matmuls (Cout, C) @ (C, width) reading statically
    shifted slices of a zero-padded activation copy kept in VMEM; everything between the
    HBM load of x and the HBM store of out stays in VMEM / vregs.
    """

    def kernel(x_ref, w1_ref, w2_ref, sb_ref, *rest):
        rest = list(rest)
        dsw_ref = rest.pop(0) if has_ds else None
        out_ref = rest.pop(0)
        if K > 1:
            xpad_ref = rest.pop(0)
            hpad_ref = rest.pop(0)

        cin = x_ref.shape[1]
        lx = x_ref.shape[2]
        cout = out_ref.shape[1]
        lout = out_ref.shape[2]
        l1 = lx + pad                       # conv1 output length
        cdtype = x_ref.dtype

        sb = sb_ref[...]                    # (Cout, 8) f32: [s1, b1, s2, b2, ds_b, 0..]
        s1, b1 = sb[:, 0:1], sb[:, 1:2]
        s2, b2 = sb[:, 2:3], sb[:, 3:4]

        if K > 1:
            # Zero ONLY the halo columns (the data region is rewritten each batch row).
            # This replaces the old full-buffer zero-fill + per-tap masked stores.
            xpad_ref[:, 0:pad] = jnp.zeros((cin, pad), cdtype)
            xpad_ref[:, pad + lx:lx + 2 * pad] = jnp.zeros((cin, pad), cdtype)
            hpad_ref[:, 0:pad] = jnp.zeros((cout, pad), cdtype)
            hpad_ref[:, pad + l1:l1 + 2 * pad] = jnp.zeros((cout, pad), cdtype)

        for b in range(B_blk):              # static, small batch block per grid step
            x = x_ref[b]                    # (Cin, Lx), compute dtype

            # ---- conv1 + bn1 + relu: K accumulated MXU matmuls over shifted reads.
            if K == 1:
                h = jnp.dot(w1_ref[0], x, preferred_element_type=jnp.float32)
            else:
                xpad_ref[:, pad:pad + lx] = x
                h = jnp.dot(w1_ref[0], xpad_ref[:, 0:l1],
                            preferred_element_type=jnp.float32)
                for tap in range(1, K):
                    off = tap * dilation
                    h = h + jnp.dot(w1_ref[tap], xpad_ref[:, off:off + l1],
                                    preferred_element_type=jnp.float32)
            h = jnp.maximum(h * s1 + b1, 0.0)           # folded BN1, f32 epilogue
            hc = h.astype(cdtype)                       # keep bf16 MXU path for conv2

            # ---- conv2 + bn2 on the VMEM-resident activation.
            if K == 1:
                y = jnp.dot(w2_ref[0], hc, preferred_element_type=jnp.float32)
            else:
                hpad_ref[:, pad:pad + l1] = hc
                y = jnp.dot(w2_ref[0], hpad_ref[:, 0:lout],
                            preferred_element_type=jnp.float32)
                for tap in range(1, K):
                    off = tap * dilation
                    y = y + jnp.dot(w2_ref[tap], hpad_ref[:, off:off + lout],
                                    preferred_element_type=jnp.float32)
            y = y * s2 + b2

            # ---- identity path computed late (short live range): re-read x from VMEM
            #      instead of carrying an f32 copy across both matmuls.
            if has_ds:
                iden = jnp.dot(dsw_ref[...], x_ref[b],
                               preferred_element_type=jnp.float32) + sb[:, 4:5]
            else:
                iden = x_ref[b].astype(jnp.float32)

            # Residual add broadcasts over length when identity length == 1, exactly as
            # PyTorch `out += identity`; final ReLU; single cast at the store.
            out_ref[b] = jnp.maximum(y + iden, 0.0).astype(out_ref.dtype)

    return kernel


# ----------------------------------------------------------------------------- params
def make_tcn_params(key, in_channels, out_channels, kernel_size):
    ks = jax.random.split(key, 14)
    p = {
        "conv1_w": 0.2 * jax.random.normal(ks[0], (out_channels, in_channels, kernel_size), jnp.float32),
        "conv1_b": 0.1 * jax.random.normal(ks[1], (out_channels,), jnp.float32),
        "bn1_gamma": 1.0 + 0.1 * jax.random.normal(ks[2], (out_channels,), jnp.float32),
        "bn1_beta": 0.1 * jax.random.normal(ks[3], (out_channels,), jnp.float32),
        "bn1_mean": 0.1 * jax.random.normal(ks[4], (out_channels,), jnp.float32),
        "bn1_var": 1.0 + 0.1 * jax.random.uniform(ks[5], (out_channels,), jnp.float32),
        "conv2_w": 0.2 * jax.random.normal(ks[6], (out_channels, out_channels, kernel_size), jnp.float32),
        "conv2_b": 0.1 * jax.random.normal(ks[7], (out_channels,), jnp.float32),
        "bn2_gamma": 1.0 + 0.1 * jax.random.normal(ks[8], (out_channels,), jnp.float32),
        "bn2_beta": 0.1 * jax.random.normal(ks[9], (out_channels,), jnp.float32),
        "bn2_mean": 0.1 * jax.random.normal(ks[10], (out_channels,), jnp.float32),
        "bn2_var": 1.0 + 0.1 * jax.random.uniform(ks[11], (out_channels,), jnp.float32),
    }
    if in_channels != out_channels:
        p["ds_w"] = 0.2 * jax.random.normal(ks[12], (out_channels, in_channels, 1), jnp.float32)
        p["ds_b"] = 0.1 * jax.random.normal(ks[13], (out_channels,), jnp.float32)
    return p


def fold_tcn_params(params, *, dtype=jnp.float32):
    """One-time folding, hoisted out of the forward path.

    BN (+ conv bias) -> per-channel scale/shift packed into a single (Cout, 8) f32
    block; conv weights -> tap-major (K, Cout, C) so the kernel uses plain leading-axis
    indexing per tap.  Weights are cast to `dtype` (e.g. bf16); scale/shift stay f32.
    """
    Cout = params["conv1_w"].shape[0]
    s1 = params["bn1_gamma"] / jnp.sqrt(params["bn1_var"] + _EPS)
    b1 = params["bn1_beta"] + (params["conv1_b"] - params["bn1_mean"]) * s1
    s2 = params["bn2_gamma"] / jnp.sqrt(params["bn2_var"] + _EPS)
    b2 = params["bn2_beta"] + (params["conv2_b"] - params["bn2_mean"]) * s2
    ds_b = params["ds_b"] if "ds_w" in params else jnp.zeros((Cout,), jnp.float32)

    sb = jnp.stack([s1, b1, s2, b2, ds_b], axis=1)          # (Cout, 5)
    sb = jnp.pad(sb, ((0, 0), (0, 8 - sb.shape[1]))).astype(jnp.float32)

    folded = {
        "w1": jnp.transpose(params["conv1_w"], (2, 0, 1)).astype(dtype),   # (K, Cout, Cin)
        "w2": jnp.transpose(params["conv2_w"], (2, 0, 1)).astype(dtype),   # (K, Cout, Cout)
        "sb": sb,                                                           # (Cout, 8) f32
    }
    if "ds_w" in params:
        folded["ds_w"] = params["ds_w"][:, :, 0].astype(dtype)              # (Cout, Cin)
    return folded


# ----------------------------------------------------------------------------- wrapper
def tcn_block_forward(x_ncl, folded, *, kernel_size, dilation,
                      l_tile=None, b_block=None, vmem_limit_bytes=None):
    """TCNBlock forward (eval mode).  x_ncl: (B, Cin, L) -> (B, Cout, L + 2*(k-1)*d).

    l_tile  : length tile (lane axis) for the kernel_size==1 path; must be a multiple of
              128 that divides L (an explicit error is raised otherwise — no silent
              full-length fallback).  When None an auto tile is picked: full L if L is
              not 128-aligned, else the largest multiple-of-128 divisor of L capped at
              ~512 lanes on 64 MiB-VMEM parts (v7x) / ~1024 on 128 MiB parts (v5e/v6e).
    b_block : batch rows per grid step (must divide B).  Defaults to the largest divisor
              of B <= 8; amortizes per-grid-step overhead and resident-weight traffic.
    vmem_limit_bytes : raise above the scoped default (16 MiB v5e / 32 MiB v6e+) when
              using large tiles; leave headroom under the 64 MiB physical VMEM on v7x.
    """
    B, Cin, L = x_ncl.shape
    K = kernel_size
    Cout = folded["sb"].shape[0]
    pad = (K - 1) * dilation
    Lout = L + 2 * pad
    has_ds = "ds_w" in folded
    cdtype = x_ncl.dtype

    # TODO(synk): the PyTorch module has no Chomp1d, so for pad > 0 the residual add only
    # broadcasts when L == 1 (larger L raises in PyTorch itself) — guard explicitly.
    if pad > 0 and L != 1:
        raise ValueError("kernel_size>1 with dilation requires seq_len == 1: the original "
                         "module's `out += identity` is otherwise ill-defined")

    if b_block is None:
        B_blk = _largest_divisor_leq(B, 8)
    else:
        if B % b_block != 0:
            raise ValueError(f"b_block={b_block} must divide batch={B}")
        B_blk = b_block
    nB = B // B_blk

    if pad > 0:
        TL, TLx, nLt = Lout, L, 1
    else:
        if l_tile is None:
            TL = _auto_l_tile(L)
        else:
            if l_tile % 128 != 0 or L % l_tile != 0:
                raise ValueError(f"l_tile={l_tile} must be a multiple of 128 that divides L={L}")
            TL = l_tile
        TLx = TL
        nLt = L // TL

    in_specs = [
        pl.BlockSpec((B_blk, Cin, TLx), lambda bi, j: (bi, 0, j)),
        pl.BlockSpec(folded["w1"].shape, lambda bi, j: (0, 0, 0)),   # VMEM-resident
        pl.BlockSpec(folded["w2"].shape, lambda bi, j: (0, 0, 0)),   # VMEM-resident
        pl.BlockSpec(folded["sb"].shape, lambda bi, j: (0, 0)),      # packed scales/shifts
    ]
    args = [x_ncl, folded["w1"], folded["w2"], folded["sb"]]
    if has_ds:
        in_specs.append(pl.BlockSpec(folded["ds_w"].shape, lambda bi, j: (0, 0)))
        args.append(folded["ds_w"])
    # NOTE: on 64 MiB-VMEM parts these constant-index weight/scale specs could also use
    # pipeline_mode=pl.Buffered(1) to drop their second pipeline buffer and buy tile size.

    scratch_shapes = []
    if K > 1:
        scratch_shapes = [pltpu.VMEM((Cin, L + 2 * pad), cdtype),    # zero-padded x
                          pltpu.VMEM((Cout, L + 3 * pad), cdtype)]   # zero-padded conv1 act

    itemsize = jnp.dtype(cdtype).itemsize
    flops = B * (2 * K * Cin * Cout * (L + pad)
                 + 2 * K * Cout * Cout * Lout
                 + (2 * Cin * Cout * L if has_ds else 0))
    bytes_accessed = ((x_ncl.size + B * Cout * Lout) * itemsize
                      + sum(a.size * jnp.dtype(a.dtype).itemsize for a in args[1:]))

    return pl.pallas_call(
        _make_fused_kernel(K, dilation, pad, has_ds, B_blk),
        out_shape=jax.ShapeDtypeStruct((B, Cout, Lout), cdtype),
        grid=(nB, nLt),
        in_specs=in_specs,
        out_specs=pl.BlockSpec((B_blk, Cout, TL), lambda bi, j: (bi, 0, j)),
        scratch_shapes=scratch_shapes,
        compiler_params=pltpu.CompilerParams(
            dimension_semantics=("parallel", "parallel"),
            vmem_limit_bytes=vmem_limit_bytes),
        cost_estimate=pl.CostEstimate(flops=int(flops), transcendentals=0,
                                      bytes_accessed=int(bytes_accessed)),
    )(*args)


# ----------------------------------------------------------------------------- reference
def _ref_conv1d(x_ncl, w, b, dilation, pad):
    y = jax.lax.conv_general_dilated(
        x_ncl, w, window_strides=(1,), padding=[(pad, pad)],
        rhs_dilation=(dilation,), dimension_numbers=("NCH", "OIH", "NCH"))
    return y + b[None, :, None]


def tcn_block_reference(x_ncl, params, *, kernel_size, dilation):
    def bn(y, g, be, m, v):
        return (y - m[None, :, None]) / jnp.sqrt(v[None, :, None] + _EPS) * g[None, :, None] \
               + be[None, :, None]

    identity = (_ref_conv1d(x_ncl, params["ds_w"], params["ds_b"], 1, 0)
                if "ds_w" in params else x_ncl)
    pad = (kernel_size - 1) * dilation
    out = _ref_conv1d(x_ncl, params["conv1_w"], params["conv1_b"], dilation, pad)
    out = jnp.maximum(bn(out, params["bn1_gamma"], params["bn1_beta"],
                         params["bn1_mean"], params["bn1_var"]), 0.0)
    out = _ref_conv1d(out, params["conv2_w"], params["conv2_b"], dilation, pad)
    out = bn(out, params["bn2_gamma"], params["bn2_beta"],
             params["bn2_mean"], params["bn2_var"])
    out = out + identity
    return jnp.maximum(out, 0.0)


# ----------------------------------------------------------------------------- main
if __name__ == "__main__":
    key = jax.random.PRNGKey(0)
    k_x, k_p1, k_p2, k_p3, k_p4 = jax.random.split(key, 5)

    # Config A: kernel_size=1, seq_len=16 (residual lengths match), downsample path, f32.
    B, Cin, Cout, L, K, D = 2, 4, 8, 16, 1, 1
    x = jax.random.normal(k_x, (B, Cin, L), jnp.float32)
    params = make_tcn_params(k_p1, Cin, Cout, K)
    folded = fold_tcn_params(params)
    out = jax.block_until_ready(tcn_block_forward(x, folded, kernel_size=K, dilation=D))
    ref = tcn_block_reference(x, params, kernel_size=K, dilation=D)
    assert out.shape == (B, Cout, L)
    assert jnp.allclose(out, ref, atol=1e-4, rtol=1e-4)

    # Config B: full dilated-conv path (kernel_size=3, dilation=2), seq_len=1 so the
    # identity broadcasts over the padded output length, exactly as in PyTorch.
    B, Cin, Cout, L, K, D = 2, 4, 8, 1, 3, 2
    x2 = jax.random.normal(k_x, (B, Cin, L), jnp.float32)
    params2 = make_tcn_params(k_p2, Cin, Cout, K)
    folded2 = fold_tcn_params(params2)
    out2 = jax.block_until_ready(tcn_block_forward(x2, folded2, kernel_size=K, dilation=D))
    ref2 = tcn_block_reference(x2, params2, kernel_size=K, dilation=D)
    assert out2.shape == (B, Cout, L + 2 * (K - 1) * D)
    assert jnp.allclose(out2, ref2, atol=1e-4, rtol=1e-4)

    # Config C: bf16 activations/weights (f32 MXU accumulation in-kernel), Cin == Cout so
    # the identity is a passthrough (nn.Identity), kernel_size=1.
    B, Cin, Cout, L, K, D = 2, 8, 8, 16, 1, 1
    x3 = jax.random.normal(k_x, (B, Cin, L), jnp.float32).astype(jnp.bfloat16)
    params3 = make_tcn_params(k_p3, Cin, Cout, K)
    folded3 = fold_tcn_params(params3, dtype=jnp.bfloat16)
    out3 = jax.block_until_ready(tcn_block_forward(x3, folded3, kernel_size=K, dilation=D))
    ref3 = tcn_block_reference(x3.astype(jnp.float32), params3, kernel_size=K, dilation=D)
    assert out3.shape == (B, Cout, L)
    assert jnp.allclose(out3.astype(jnp.float32), ref3, atol=5e-2, rtol=5e-2)

    # Config D: exercises the length-tiling + batch-blocking path (L=256, l_tile=128,
    # B_blk=4 -> grid (1, 2)), downsample path, f32.
    B, Cin, Cout, L, K, D = 4, 4, 8, 256, 1, 1
    x4 = jax.random.normal(k_x, (B, Cin, L), jnp.float32)
    params4 = make_tcn_params(k_p4, Cin, Cout, K)
    folded4 = fold_tcn_params(params4)
    out4 = jax.block_until_ready(
        tcn_block_forward(x4, folded4, kernel_size=K, dilation=D, l_tile=128))
    ref4 = tcn_block_reference(x4, params4, kernel_size=K, dilation=D)
    assert out4.shape == (B, Cout, L)
    assert jnp.allclose(out4, ref4, atol=1e-4, rtol=1e-4)

    print("KERNEL_OK")
</pallas_src>

<mosaic_0001>
module attributes {stable_mosaic.version = 11 : i64} {
  func.func @kernel(%arg0: i32, %arg1: i32, %arg2: memref<2x4x16xf32, #tpu.memory_space<vmem>>, %arg3: memref<1x8x4xf32, #tpu.memory_space<vmem>>, %arg4: memref<1x8x8xf32, #tpu.memory_space<vmem>>, %arg5: memref<8x8xf32, #tpu.memory_space<vmem>>, %arg6: memref<8x4xf32, #tpu.memory_space<vmem>>, %arg7: memref<2x8x16xf32, #tpu.memory_space<vmem>>) attributes {dimension_semantics = [#tpu.dimension_semantics<parallel>, #tpu.dimension_semantics<parallel>], iteration_bounds = array<i64: 1, 1>, scalar_prefetch = 0 : i64, scratch_operands = 0 : i64, tpu.core_type = #tpu.core_type<tc>, window_params = [{transform_indices = @transform_0, window_bounds = array<i64: 2, 4, 16>}, {pipeline_mode = #tpu.pipeline_mode<synchronous>, transform_indices = @transform_1, window_bounds = array<i64: 1, 8, 4>}, {pipeline_mode = #tpu.pipeline_mode<synchronous>, transform_indices = @transform_2, window_bounds = array<i64: 1, 8, 8>}, {pipeline_mode = #tpu.pipeline_mode<synchronous>, transform_indices = @transform_3, window_bounds = array<i64: 8, 8>}, {pipeline_mode = #tpu.pipeline_mode<synchronous>, transform_indices = @transform_4, window_bounds = array<i64: 8, 4>}, {transform_indices = @transform_5, window_bounds = array<i64: 2, 8, 16>}]} {
    %c0 = arith.constant 0 : index
    %c0_0 = arith.constant 0 : index
    %0 = vector.load %arg5[%c0, %c0_0] : memref<8x8xf32, #tpu.memory_space<vmem>>, vector<8x8xf32>
    %1 = vector.extract_strided_slice %0 {offsets = [0, 0], sizes = [8, 1], strides = [1, 1]} : vector<8x8xf32> to vector<8x1xf32>
    %2 = vector.extract_strided_slice %0 {offsets = [0, 1], sizes = [8, 1], strides = [1, 1]} : vector<8x8xf32> to vector<8x1xf32>
    %3 = vector.extract_strided_slice %0 {offsets = [0, 2], sizes = [8, 1], strides = [1, 1]} : vector<8x8xf32> to vector<8x1xf32>
    %4 = vector.extract_strided_slice %0 {offsets = [0, 3], sizes = [8, 1], strides = [1, 1]} : vector<8x8xf32> to vector<8x1xf32>
    %c0_1 = arith.constant 0 : index
    %c0_2 = arith.constant 0 : index
    %c0_3 = arith.constant 0 : index
    %5 = vector.load %arg2[%c0_1, %c0_2, %c0_3] : memref<2x4x16xf32, #tpu.memory_space<vmem>>, vector<1x4x16xf32>
    %6 = vector.shape_cast %5 : vector<1x4x16xf32> to vector<4x16xf32>
    %c0_4 = arith.constant 0 : index
    %c0_5 = arith.constant 0 : index
    %c0_6 = arith.constant 0 : index
    %7 = vector.load %arg3[%c0_4, %c0_5, %c0_6] : memref<1x8x4xf32, #tpu.memory_space<vmem>>, vector<1x8x4xf32>
    %8 = vector.shape_cast %7 : vector<1x8x4xf32> to vector<8x4xf32>
    %cst = arith.constant dense<0.000000e+00> : vector<8x16xf32>
    %9 = tpu.matmul %8, %6, %cst {dimension_numbers = #tpu.dot_dimension_numbers<[1], [0], [0], [1], [0, 0, 1, 1], [], []>} : vector<8x4xf32>, vector<4x16xf32>, vector<8x16xf32> -> vector<8x16xf32>
    %10 = vector.broadcast %1 : vector<8x1xf32> to vector<8x16xf32>
    %11 = arith.mulf %9, %10 : vector<8x16xf32>
    %12 = vector.broadcast %2 : vector<8x1xf32> to vector<8x16xf32>
    %13 = arith.addf %11, %12 : vector<8x16xf32>
    %cst_7 = arith.constant 0.000000e+00 : f32
    %14 = vector.broadcast %cst_7 : f32 to vector<8x16xf32>
    %15 = arith.maximumf %13, %14 : vector<8x16xf32>
    %c0_8 = arith.constant 0 : index
    %c0_9 = arith.constant 0 : index
    %c0_10 = arith.constant 0 : index
    %16 = vector.load %arg4[%c0_8, %c0_9, %c0_10] : memref<1x8x8xf32, #tpu.memory_space<vmem>>, vector<1x8x8xf32>
    %17 = vector.shape_cast %16 : vector<1x8x8xf32> to vector<8x8xf32>
    %cst_11 = arith.constant dense<0.000000e+00> : vector<8x16xf32>
    %18 = tpu.matmul %17, %15, %cst_11 {dimension_numbers = #tpu.dot_dimension_numbers<[1], [0], [0], [1], [0, 0, 1, 1], [], []>} : vector<8x8xf32>, vector<8x16xf32>, vector<8x16xf32> -> vector<8x16xf32>
    %19 = vector.broadcast %3 : vector<8x1xf32> to vector<8x16xf32>
    %20 = arith.mulf %18, %19 : vector<8x16xf32>
    %21 = vector.broadcast %4 : vector<8x1xf32> to vector<8x16xf32>
    %22 = arith.addf %20, %21 : vector<8x16xf32>
    %c0_12 = arith.constant 0 : index
    %c0_13 = arith.constant 0 : index
    %23 = vector.load %arg6[%c0_12, %c0_13] : memref<8x4xf32, #tpu.memory_space<vmem>>, vector<8x4xf32>
    %c0_14 = arith.constant 0 : index
    %c0_15 = arith.constant 0 : index
    %c0_16 = arith.constant 0 : index
    %24 = vector.load %arg2[%c0_14, %c0_15, %c0_16] : memref<2x4x16xf32, #tpu.memory_space<vmem>>, vector<1x4x16xf32>
    %25 = vector.shape_cast %24 : vector<1x4x16xf32> to vector<4x16xf32>
    %cst_17 = arith.constant dense<0.000000e+00> : vector<8x16xf32>
    %26 = tpu.matmul %23, %25, %cst_17 {dimension_numbers = #tpu.dot_dimension_numbers<[1], [0], [0], [1], [0, 0, 1, 1], [], []>} : vector<8x4xf32>, vector<4x16xf32>, vector<8x16xf32> -> vector<8x16xf32>
    %27 = vector.extract_strided_slice %0 {offsets = [0, 4], sizes = [8, 1], strides = [1, 1]} : vector<8x8xf32> to vector<8x1xf32>
    %28 = vector.broadcast %27 : vector<8x1xf32> to vector<8x16xf32>
    %29 = arith.addf %26, %28 : vector<8x16xf32>
    %30 = arith.addf %22, %29 : vector<8x16xf32>
    %cst_18 = arith.constant 0.000000e+00 : f32
    %31 = vector.broadcast %cst_18 : f32 to vector<8x16xf32>
    %32 = arith.maximumf %30, %31 : vector<8x16xf32>
    %c0_19 = arith.constant 0 : index
    %c0_20 = arith.constant 0 : index
    %c0_21 = arith.constant 0 : index
    %33 = vector.load %arg7[%c0_19, %c0_20, %c0_21] : memref<2x8x16xf32, #tpu.memory_space<vmem>>, vector<1x8x16xf32>
    %34 = vector.shape_cast %33 : vector<1x8x16xf32> to vector<8x16xf32>
    %35 = vector.shape_cast %32 : vector<8x16xf32> to vector<1x8x16xf32>
    tpu.vector_store %arg7[%c0_19, %c0_20, %c0_21], %35 {strides = array<i32>} : memref<2x8x16xf32, #tpu.memory_space<vmem>>, vector<1x8x16xf32>,
    %c1 = arith.constant 1 : index
    %c0_22 = arith.constant 0 : index
    %c0_23 = arith.constant 0 : index
    %36 = vector.load %arg2[%c1, %c0_22, %c0_23] : memref<2x4x16xf32, #tpu.memory_space<vmem>>, vector<1x4x16xf32>
    %37 = vector.shape_cast %36 : vector<1x4x16xf32> to vector<4x16xf32>
    %c0_24 = arith.constant 0 : index
    %c0_25 = arith.constant 0 : index
    %c0_26 = arith.constant 0 : index
    %38 = vector.load %arg3[%c0_24, %c0_25, %c0_26] : memref<1x8x4xf32, #tpu.memory_space<vmem>>, vector<1x8x4xf32>
    %39 = vector.shape_cast %38 : vector<1x8x4xf32> to vector<8x4xf32>
    %cst_27 = arith.constant dense<0.000000e+00> : vector<8x16xf32>
    %40 = tpu.matmul %39, %37, %cst_27 {dimension_numbers = #tpu.dot_dimension_numbers<[1], [0], [0], [1], [0, 0, 1, 1], [], []>} : vector<8x4xf32>, vector<4x16xf32>, vector<8x16xf32> -> vector<8x16xf32>
    %41 = vector.broadcast %1 : vector<8x1xf32> to vector<8x16xf32>
    %42 = arith.mulf %40, %41 : vector<8x16xf32>
    %43 = vector.broadcast %2 : vector<8x1xf32> to vector<8x16xf32>
    %44 = arith.addf %42, %43 : vector<8x16xf32>
    %cst_28 = arith.constant 0.000000e+00 : f32
    %45 = vector.broadcast %cst_28 : f32 to vector<8x16xf32>
    %46 = arith.maximumf %44, %45 : vector<8x16xf32>
    %c0_29 = arith.constant 0 : index
    %c0_30 = arith.constant 0 : index
    %c0_31 = arith.constant 0 : index
    %47 = vector.load %arg4[%c0_29, %c0_30, %c0_31] : memref<1x8x8xf32, #tpu.memory_space<vmem>>, vector<1x8x8xf32>
    %48 = vector.shape_cast %47 : vector<1x8x8xf32> to vector<8x8xf32>
    %cst_32 = arith.constant dense<0.000000e+00> : vector<8x16xf32>
    %49 = tpu.matmul %48, %46, %cst_32 {dimension_numbers = #tpu.dot_dimension_numbers<[1], [0], [0], [1], [0, 0, 1, 1], [], []>} : vector<8x8xf32>, vector<8x16xf32>, vector<8x16xf32> -> vector<8x16xf32>
    %50 = vector.broadcast %3 : vector<8x1xf32> to vector<8x16xf32>
    %51 = arith.mulf %49, %50 : vector<8x16xf32>
    %52 = vector.broadcast %4 : vector<8x1xf32> to vector<8x16xf32>
    %53 = arith.addf %51, %52 : vector<8x16xf32>
    %c0_33 = arith.constant 0 : index
    %c0_34 = arith.constant 0 : index
    %54 = vector.load %arg6[%c0_33, %c0_34] : memref<8x4xf32, #tpu.memory_space<vmem>>, vector<8x4xf32>
    %c1_35 = arith.constant 1 : index
    %c0_36 = arith.constant 0 : index
    %c0_37 = arith.constant 0 : index
    %55 = vector.load %arg2[%c1_35, %c0_36, %c0_37] : memref<2x4x16xf32, #tpu.memory_space<vmem>>, vector<1x4x16xf32>
    %56 = vector.shape_cast %55 : vector<1x4x16xf32> to vector<4x16xf32>
    %cst_38 = arith.constant dense<0.000000e+00> : vector<8x16xf32>
    %57 = tpu.matmul %54, %56, %cst_38 {dimension_numbers = #tpu.dot_dimension_numbers<[1], [0], [0], [1], [0, 0, 1, 1], [], []>} : vector<8x4xf32>, vector<4x16xf32>, vector<8x16xf32> -> vector<8x16xf32>
    %58 = vector.extract_strided_slice %0 {offsets = [0, 4], sizes = [8, 1], strides = [1, 1]} : vector<8x8xf32> to vector<8x1xf32>
    %59 = vector.broadcast %58 : vector<8x1xf32> to vector<8x16xf32>
    %60 = arith.addf %57, %59 : vector<8x16xf32>
    %61 = arith.addf %53, %60 : vector<8x16xf32>
    %cst_39 = arith.constant 0.000000e+00 : f32
    %62 = vector.broadcast %cst_39 : f32 to vector<8x16xf32>
    %63 = arith.maximumf %61, %62 : vector<8x16xf32>
    %c1_40 = arith.constant 1 : index
    %c0_41 = arith.constant 0 : index
    %c0_42 = arith.constant 0 : index
    %64 = vector.load %arg7[%c1_40, %c0_41, %c0_42] : memref<2x8x16xf32, #tpu.memory_space<vmem>>, vector<1x8x16xf32>
    %65 = vector.shape_cast %64 : vector<1x8x16xf32> to vector<8x16xf32>
    %66 = vector.shape_cast %63 : vector<8x16xf32> to vector<1x8x16xf32>
    tpu.vector_store %arg7[%c1_40, %c0_41, %c0_42], %66 {strides = array<i32>} : memref<2x8x16xf32, #tpu.memory_space<vmem>>, vector<1x8x16xf32>,
    return
  }
  func.func @transform_0(%arg0: i32, %arg1: i32) -> (i32, i32, i32) {
    %c0_i32 = arith.constant 0 : i32
    %c0_i32_0 = arith.constant 0 : i32
    return %arg0, %c0_i32, %arg1 : i32, i32, i32
  }
  func.func @transform_1(%arg0: i32, %arg1: i32) -> (i32, i32, i32) {
    %c0_i32 = arith.constant 0 : i32
    %c0_i32_0 = arith.constant 0 : i32
    %c0_i32_1 = arith.constant 0 : i32
    %c0_i32_2 = arith.constant 0 : i32
    return %c0_i32, %c0_i32_0, %c0_i32_1 : i32, i32, i32
  }
  func.func @transform_2(%arg0: i32, %arg1: i32) -> (i32, i32, i32) {
    %c0_i32 = arith.constant 0 : i32
    %c0_i32_0 = arith.constant 0 : i32
    %c0_i32_1 = arith.constant 0 : i32
    %c0_i32_2 = arith.constant 0 : i32
    return %c0_i32, %c0_i32_0, %c0_i32_1 : i32, i32, i32
  }
  func.func @transform_3(%arg0: i32, %arg1: i32) -> (i32, i32) {
    %c0_i32 = arith.constant 0 : i32
    %c0_i32_0 = arith.constant 0 : i32
    %c0_i32_1 = arith.constant 0 : i32
    return %c0_i32, %c0_i32_0 : i32, i32
  }
  func.func @transform_4(%arg0: i32, %arg1: i32) -> (i32, i32) {
    %c0_i32 = arith.constant 0 : i32
    %c0_i32_0 = arith.constant 0 : i32
    %c0_i32_1 = arith.constant 0 : i32
    return %c0_i32, %c0_i32_0 : i32, i32
  }
  func.func @transform_5(%arg0: i32, %arg1: i32) -> (i32, i32, i32) {
    %c0_i32 = arith.constant 0 : i32
    %c0_i32_0 = arith.constant 0 : i32
    return %arg0, %c0_i32, %arg1 : i32, i32, i32
  }
}

</mosaic_0001>

<bundles_post_ra>
// kernel: tpu_custom_call.1
= control target key start
LH: loop header
LB: loop body
LE: loop exit
PB: predicated region body
PF: predicated region fallthrough
CT: control target
= control target key end

     0   :  { %vm28_vm0 = vcmask 1043456   ;;  %v624_v2 = vmov 0.0   ;;  %vm625_vm1 = vmmov 0   ;;  %vm24_vm2 = vcmask 31744   ;;  %s703_s0 = inlined_call_operand.vmem [shape: f32[2,4,16], index: 0, kind: input, shape index: {}]   ;;  %s704_s1 = inlined_call_operand.vmem [shape: f32[1,8,4], index: 1, kind: input, shape index: {}]   ;;  %s705_s2 = inlined_call_operand.vmem [shape: f32[1,8,8], index: 2, kind: input, shape index: {}]   ;;  %s706_s3 = inlined_call_operand.vmem [shape: f32[8,8], index: 3, kind: input, shape index: {}]   ;;  %s707_s4 = inlined_call_operand.vmem [shape: f32[8,4], index: 4, kind: input, shape index: {}]   ;;  %s708_s5 = inlined_call_operand.hbm [shape: f32[2,8,16], index: 5, kind: output, shape index: {}]  }
   0x1   :  { %v22_v0 = vld [vmem:[%s703_s0] sm:$0xf]  ;;  %556 = vmatprep.subr.mxu0 %v624_v2  ;;  %558 = vmatprep.mubr.msk.f32.mxu0 %vm625_vm1, %v624_v2 }
   0x2   :  { %v23_v1 = vld [vmem:[%s704_s1] sm:$0xff] }
   0x3   :  { %v21_v3 = vld [vmem:[%s706_s3] sm:$0xff] }
   0x4   :  { %10 = vsyncpa [#allocation3], 0  ;;  %557 = vmatpush3.msk.msra.mxu0 %vm28_vm0, %v22_v0  ;;  %v626_v4 = vmov 0   ;;  %561 = vmatprep.subr.mxu1 %v624_v2  ;;  %v627_v5 = vmov 1   ;;  %v199_v6 = vld [vmem:[%s707_s4] sm:$0xff]  ;;  %v628_v7 = vmov 2  }
   0x5   :  { %596 = vset.pattern.permute.xlu0 %v626_v4  ;;  %559 = vmatmul.mubr.msk.f32.vlgmr.msra.gmra.mxu0 %vm24_vm2, %v23_v1  ;;  %v629_v8 = vmov 4   ;;  %v630_v9 = vmov 3   ;;  %v114_v17 = vld [vmem:[%s705_s2] sm:$0xff]  ;;  %vm115_vm3 = vcmask 64512   ;;  %vm279_vm4 = vcmask 130048  }
   0x6   :  { %104 = vperm.xlu0 %596, %v21_v3   ;;  %563 = vmatprep.mubr.msk.f32.mxu1 %vm625_vm1, %v624_v2  ;;  %v538_v18 = vld [vmem:[%s703_s0 + $0x4] sm:$0xf]  ;;  %s631_s0 = smov [#allocation2]  }
   0x7   :  { %566 = vmatprep.subr.mxu0 %v624_v2  ;;  %568 = vmatprep.mubr.msk.f32.mxu0 %vm625_vm1, %v624_v2  ;;  %s522_s2 = sshll.u32 %s631_s0, 4  ;;  %s523_s2 = int_to_ptr.vmem [resolvable:$true] %s522_s2 }
   0x8   :  { %567 = vmatpush3.msk.msra.mxu0 %vm28_vm0, %v22_v0  ;;  %598 = vset.pattern.permute.xlu1 %v628_v7  ;;  %s602_s27 = scalar_lea.vmem %s523_s2, 256  ;;  %p607_p1 = scmp.lt.s32.totalorder %s523_s2, %s523_s2 }
   0x9   :  { %576 = vmatprep.subr.mxu0 %v624_v2  ;;  %569 = vmatmul.mubr.msk.f32.vlgmr.msra.gmra.mxu0 %vm24_vm2, %v199_v6  ;;  %p603_p0 = scmp.ne.s32.totalorder %s523_s2, %s602_s27  ;;  %p608_p2 = scmp.lt.s32.totalorder %s602_s27, %s602_s27 }
   0xa   :  { %597 = vset.pattern.permute.xlu0 %v627_v5  ;;  %578 = vmatprep.mubr.msk.f32.mxu0 %vm625_vm1, %v624_v2 }
   0xb   :  { %109 = vperm.xlu0 %597, %v21_v3   ;;  %190 = vperm.xlu1 %598, %v21_v3   ;;  %p609_p3 = por %p608_p2, %p607_p1 }
   0xd   :  { %p610_p4 = pnand %p609_p3, %p603_p0 }
   0xf   :  { %601 = vset.pattern.permute.xlu0 %v629_v8  ;;  %599 = vset.pattern.permute.xlu1 %v630_v9 }
  0x10   :  { %195 = vperm.xlu1 %599, %v21_v3  }
  0x14   :  { %600 = vset.pattern.permute.xlu1 %v629_v8 }
  0x15   :  { %201 = vperm.xlu1 %600, %v21_v3  }
  0x81   :  { %v105_v10 = vpop.permute.xlu0 %104 }
  0x86   :  { %v110_v12 = vpop.permute.xlu0 %109  ;;  %v191_v21 = vpop.permute.xlu1 %190 }
  0x8b   :  { %v196_v22 = vpop.permute.xlu1 %195 }
  0x90   :  { %v202_v23 = vpop.permute.xlu1 %201 }
  0xc5   :  { %v98_v11 = vpop.f32.mrf.mxu0 }
  0xc6   :  { %v107_v13 = vmul.f32 %v105_v10, %v98_v11 }
  0xc7   :  { %v560_v14 = vpop.f32.mrf.mxu0 }
  0xc8   :  { %v112_v15 = vadd.f32 %v110_v12, %v107_v13 }
  0xc9   :  { %v273_v19 = vpop.f32.mrf.mxu0 }
  0xca   :  { %v113_v16 = vmax.f32 %v112_v15, 0.0  ;;  %v274_v26 = vadd.f32 %v273_v19, %v202_v23 }
  0xcb   :  { %v570_v20 = vpop.f32.mrf.mxu0 }
  0xcc   :  { %562 = vmatpush3.msra.mxu1 %v113_v16 }
  0xcd   :  { %564 = vmatmul.mubr.msk.f32.vlgmr.msra.gmra.mxu1 %vm115_vm3, %v114_v17  ;;  %571 = vmatprep.subr.mxu1 %v624_v2 }
  0xce   :  { %572 = vmatpush3.msk.msra.mxu1 %vm28_vm0, %v538_v18  ;;  %573 = vmatprep.mubr.msk.f32.mxu1 %vm625_vm1, %v624_v2 }
  0xcf   :  { %581 = vmatprep.subr.mxu1 %v624_v2 }
  0xd1   :  { %574 = vmatmul.mubr.msk.f32.vlgmr.msra.gmra.mxu1 %vm24_vm2, %v23_v1 }
  0xd2   :  { %582 = vmatpush3.msk.msra.mxu1 %vm28_vm0, %v538_v18  ;;  %583 = vmatprep.mubr.msk.f32.mxu1 %vm625_vm1, %v624_v2 }
  0xd5   :  { %584 = vmatmul.mubr.msk.f32.vlgmr.msra.gmra.mxu1 %vm24_vm2, %v199_v6 }
 0x18d   :  { %v185_v24 = vpop.f32.mrf.mxu1 }
 0x18e   :  { %v193_v25 = vmul.f32 %v191_v21, %v185_v24 }
 0x18f   :  { %v565_v27 = vpop.f32.mrf.mxu1 }
 0x190   :  { %v198_v28 = vadd.f32 %v196_v22, %v193_v25 }
 0x191   :  { %v356_v29 = vpop.f32.mrf.mxu1 }
 0x192   :  { %v277_v30 = vadd.f32 %v274_v26, %v198_v28  ;;  %v360_v31 = vmul.f32 %v356_v29, %v105_v10 }
 0x193   :  { %v575_v32 = vpop.f32.mrf.mxu1 }
 0x194   :  { %v278_v33 = vmax.f32 %v277_v30, 0.0  ;;  %v361_v34 = vadd.f32 %v360_v31, %v110_v12 }
 0x195   :  { %v509_v36 = vpop.f32.mrf.mxu1 }
 0x196   :  { %280 = vst.msk [vmem:[#allocation2] sm:$0xff] %vm279_vm4, %v278_v33  ;;  %v362_v35 = vmax.f32 %v361_v34, 0.0  ;;  %v510_v40 = vadd.f32 %v509_v36, %v202_v23 }
 0x197   :  { %v585_v37 = vpop.f32.mrf.mxu1 }
 0x198   :  { %577 = vmatpush3.msra.mxu0 %v362_v35 }
 0x199   :  { %579 = vmatmul.mubr.msk.f32.vlgmr.msra.gmra.mxu0 %vm115_vm3, %v114_v17 }
 0x259   :  { %v433_v38 = vpop.f32.mrf.mxu0 }
 0x25a   :  { %v437_v39 = vmul.f32 %v433_v38, %v191_v21 }
 0x25b   :  { %v580_v41 = vpop.f32.mrf.mxu0 }
 0x25c   :  { %v438_v42 = vadd.f32 %v437_v39, %v196_v22 }
 0x25e   :  { %v513_v43 = vadd.f32 %v510_v40, %v438_v42 }
 0x260   :  { %v514_v44 = vmax.f32 %v513_v43, 0.0 }
 0x262   :  { %516 = vst.msk [vmem:[#allocation2 + $0x8] sm:$0xff] %vm279_vm4, %v514_v44 }
 0x263   :  { %613 = shalt.err (!%p610_p4)
}
 0x264   :  { %s632_s28 = smov 128   ;;  %s633_s29 = smov 8  }
 0x265   :  { %528 = dma.vmem_to_hbm [thread:$0]  %s523_s2, 256, %s708_s5, [#allocation3], %s632_s28, %s632_s28, %s633_s29  }
 0x266   :  { %622 = dma.done.wait [#allocation3], 256  }
 0x267   :  { %623 = vsyncadd [#allocation3], 4294967040 }
 0x268   :  { %532 = vsyncpa [#allocation3], 1 }

</bundles_post_ra>
